<compile_context>
chip_gen: v7x
topology: tpu7x:2x2x1
jax: 0.10.0
libtpu: 0.0.40
codegen_flags: <defaults>
</compile_context>

<pallas_src>
import functools

import jax
import jax.numpy as jnp
from jax.experimental import pallas as pl
from jax.experimental.pallas import tpu as pltpu


_TARGET_BLOCK_BYTES = 4 * 1024 * 1024   # combined x+y bytes per grid step (~8 MiB double-buffered VMEM)
_MAX_ROW_TILE = 4096                    # keeps blocks comfortably inside v7x's 64 MiB VMEM too
_MAX_COL_TILE = 2048                    # tile wide class counts along the lane axis


def _round_up(v, m):
    return ((v + m - 1) // m) * m


def _pick_tiles(n, c, bytes_per_elem_pair):
    tile_c = c if c <= _MAX_COL_TILE else _MAX_COL_TILE
    rows_budget = max(8, _TARGET_BLOCK_BYTES // max(1, tile_c * bytes_per_elem_pair))
    row_tile = min(_MAX_ROW_TILE, (rows_budget // 8) * 8, _round_up(n, 8))
    row_tile = max(8, row_tile)
    return row_tile, tile_c


def _bce_partial_kernel(x_ref, y_ref, o_ref, *, n_rows, row_tile, need_row_mask):
    """Writes per-block column partial sums of the stable BCE-with-logits loss."""
    x = x_ref[...].astype(jnp.float32)
    y = y_ref[...].astype(jnp.float32)          # mirrors y.float() in the module

    # Numerically stable BCE-with-logits (same formulation PyTorch uses).
    per = jnp.maximum(x, 0.0) - x * y + jnp.log1p(jnp.exp(-jnp.abs(x)))

    if need_row_mask:
        # Last row-block may overhang N; zero padded rows so the sum stays exact.
        i = pl.program_id(0)
        rows = jax.lax.broadcasted_iota(jnp.int32, per.shape, 0) + i * row_tile
        per = jnp.where(rows < n_rows, per, 0.0)

    # Reduce row_tile rows to 8 sublanes with a static pairwise add tree of
    # tile-aligned (8, tile_c) slices (VPU-only, short dependency chain).
    rt, tc = per.shape
    chunks = [per[k * 8:(k + 1) * 8, :] for k in range(rt // 8)]
    while len(chunks) > 1:
        nxt = [chunks[a] + chunks[a + 1] for a in range(0, len(chunks) - 1, 2)]
        if len(chunks) % 2:
            nxt.append(chunks[-1])
        chunks = nxt
    o_ref[...] = chunks[0]


def multilabel_bce_loss(x, y, weight=None):
    """Pallas equivalent of MultiLabelBCELoss(weight).forward(x, y). Returns scalar f32."""
    N, C = x.shape
    assert y.shape == (N, C), (x.shape, y.shape)

    pair_bytes = jnp.dtype(x.dtype).itemsize + jnp.dtype(y.dtype).itemsize
    row_tile, tile_c = _pick_tiles(N, C, pair_bytes)
    nrb = pl.cdiv(N, row_tile)
    ncb = pl.cdiv(C, tile_c)

    kernel = functools.partial(
        _bce_partial_kernel,
        n_rows=N,
        row_tile=row_tile,
        need_row_mask=(N % row_tile != 0),
    )

    partials = pl.pallas_call(
        kernel,
        out_shape=jax.ShapeDtypeStruct((nrb * 8, C), jnp.float32),
        grid_spec=pltpu.PrefetchScalarGridSpec(
            num_scalar_prefetch=0,
            grid=(nrb, ncb),
            in_specs=[
                pl.BlockSpec((row_tile, tile_c), lambda i, j: (i, j)),   # logits tile
                pl.BlockSpec((row_tile, tile_c), lambda i, j: (i, j)),   # targets tile
            ],
            out_specs=pl.BlockSpec((8, tile_c), lambda i, j: (i, j)),    # lane-dense partials
        ),
        compiler_params=pltpu.CompilerParams(
            # Every grid step owns a distinct output block -> fully parallel
            # (v7x can shard across both TensorCores; harmless on v5e/v6e).
            dimension_semantics=("parallel", "parallel"),
            vmem_limit_bytes=32 * 1024 * 1024,
        ),
    )(x, y)

    # Epilogue on the tiny partial-sum array: weight, reduce, mean over N*C.
    col_sums = jnp.sum(partials, axis=0)                      # (C,) f32
    if weight is None:
        total = jnp.sum(col_sums)
    else:
        total = jnp.sum(col_sums * weight.astype(jnp.float32).reshape(-1))
    return total / jnp.float32(N * C)


def _reference_loss(x, y, weight=None):
    xf = x.astype(jnp.float32)
    yf = y.astype(jnp.float32)
    per = jnp.maximum(xf, 0.0) - xf * yf + jnp.log1p(jnp.exp(-jnp.abs(xf)))
    if weight is not None:
        per = per * weight.astype(jnp.float32).reshape(1, -1)
    return jnp.mean(per)


if __name__ == "__main__":
    key = jax.random.PRNGKey(0)
    k1, k2, k3, k4, k5 = jax.random.split(key, 5)

    # Case 1: per-class weight, shapes aligned with the tile grid.
    N, C = 16, 128
    x = jax.random.normal(k1, (N, C), dtype=jnp.float32) * 2.0         # logits
    y = (jax.random.uniform(k2, (N, C)) > 0.5).astype(jnp.float32)     # multi-hot targets
    weight = jax.random.uniform(k3, (C,), dtype=jnp.float32) + 0.5     # per-class weights

    loss = multilabel_bce_loss(x, y, weight)
    jax.block_until_ready(loss)
    ref = _reference_loss(x, y, weight)
    assert jnp.allclose(loss, ref, rtol=1e-5, atol=1e-5), (loss, ref)

    # Case 2: no weight, batch not a multiple of 8 (exercises the row mask /
    # ragged last block path).
    N2, C2 = 20, 128
    x2 = jax.random.normal(k4, (N2, C2), dtype=jnp.float32) * 2.0
    y2 = (jax.random.uniform(k5, (N2, C2)) > 0.5).astype(jnp.float32)

    loss2 = multilabel_bce_loss(x2, y2)
    jax.block_until_ready(loss2)
    ref2 = _reference_loss(x2, y2)
    assert jnp.allclose(loss2, ref2, rtol=1e-5, atol=1e-5), (loss2, ref2)

    print("KERNEL_OK")
</pallas_src>

<mosaic_0001>
module attributes {stable_mosaic.version = 11 : i64} {
  func.func @_bce_partial_kernel(%arg0: i32, %arg1: i32, %arg2: memref<16x128xf32, #tpu.memory_space<vmem>>, %arg3: memref<16x128xf32, #tpu.memory_space<vmem>>, %arg4: memref<8x128xf32, #tpu.memory_space<vmem>>) attributes {dimension_semantics = [#tpu.dimension_semantics<parallel>, #tpu.dimension_semantics<parallel>], iteration_bounds = array<i64: 1, 1>, scalar_prefetch = 0 : i64, scratch_operands = 0 : i64, tpu.core_type = #tpu.core_type<tc>, window_params = [{transform_indices = @transform_0, window_bounds = array<i64: 16, 128>}, {transform_indices = @transform_1, window_bounds = array<i64: 16, 128>}, {transform_indices = @transform_2, window_bounds = array<i64: 8, 128>}]} {
    %c0 = arith.constant 0 : index
    %c0_0 = arith.constant 0 : index
    %0 = vector.load %arg2[%c0, %c0_0] : memref<16x128xf32, #tpu.memory_space<vmem>>, vector<16x128xf32>
    %c0_1 = arith.constant 0 : index
    %c0_2 = arith.constant 0 : index
    %1 = vector.load %arg3[%c0_1, %c0_2] : memref<16x128xf32, #tpu.memory_space<vmem>>, vector<16x128xf32>
    %cst = arith.constant 0.000000e+00 : f32
    %2 = vector.broadcast %cst : f32 to vector<16x128xf32>
    %3 = arith.maximumf %0, %2 : vector<16x128xf32>
    %4 = arith.mulf %0, %1 : vector<16x128xf32>
    %5 = arith.subf %3, %4 : vector<16x128xf32>
    %6 = math.absf %0 : vector<16x128xf32>
    %cst_3 = arith.constant 0.000000e+00 : f32
    %7 = vector.broadcast %cst_3 : f32 to vector<16x128xf32>
    %8 = arith.subf %7, %6 : vector<16x128xf32>
    %9 = math.exp %8 : vector<16x128xf32>
    %10 = math.log1p %9 : vector<16x128xf32>
    %11 = arith.addf %5, %10 : vector<16x128xf32>
    %12 = vector.extract_strided_slice %11 {offsets = [0, 0], sizes = [8, 128], strides = [1, 1]} : vector<16x128xf32> to vector<8x128xf32>
    %13 = vector.extract_strided_slice %11 {offsets = [8, 0], sizes = [8, 128], strides = [1, 1]} : vector<16x128xf32> to vector<8x128xf32>
    %14 = arith.addf %12, %13 : vector<8x128xf32>
    %c0_4 = arith.constant 0 : index
    %c0_5 = arith.constant 0 : index
    %15 = vector.load %arg4[%c0_4, %c0_5] : memref<8x128xf32, #tpu.memory_space<vmem>>, vector<8x128xf32>
    tpu.vector_store %arg4[%c0_4, %c0_5], %14 {strides = array<i32>} : memref<8x128xf32, #tpu.memory_space<vmem>>, vector<8x128xf32>,
    return
  }
  func.func @transform_0(%arg0: i32, %arg1: i32) -> (i32, i32) {
    %c0_i32 = arith.constant 0 : i32
    return %arg0, %arg1 : i32, i32
  }
  func.func @transform_1(%arg0: i32, %arg1: i32) -> (i32, i32) {
    %c0_i32 = arith.constant 0 : i32
    return %arg0, %arg1 : i32, i32
  }
  func.func @transform_2(%arg0: i32, %arg1: i32) -> (i32, i32) {
    %c0_i32 = arith.constant 0 : i32
    return %arg0, %arg1 : i32, i32
  }
}

</mosaic_0001>

<bundles_post_ra>
// kernel: tpu_custom_call.1
= control target key start
LH: loop header
LB: loop body
LE: loop exit
PB: predicated region body
PF: predicated region fallthrough
CT: control target
= control target key end

     0   :  { %7 = vsyncpa [#allocation3], 0  ;;  %s237_s0 = inlined_call_operand.hbm [shape: f32[16,128], index: 0, kind: input, shape index: {}]   ;;  %s238_s1 = inlined_call_operand.hbm [shape: f32[16,128], index: 1, kind: input, shape index: {}]   ;;  %s239_s2 = inlined_call_operand.hbm [shape: f32[8,128], index: 2, kind: output, shape index: {}]  }
   0x1   :  { %8 = vsyncpa [#allocation6], 0 }
   0x2   :  { %9 = vsyncpa [#allocation4], 0  ;;  %s181_s9 = smov [#allocation2]   ;;  %s109_s13 = scalar_lea.hbm %s237_s0, 256 }
   0x3   :  { %s15_s10 = sshll.u32 %s181_s9, 4  ;;  %p110_p0 = scmp.ne.s32.totalorder %s237_s0, %s109_s13  ;;  %s16_s10 = int_to_ptr.vmem [resolvable:$true] %s15_s10 }
   0x4   :  { %p113_p1 = scmp.lt.u32.totalorder %s109_s13, %s237_s0 }
   0x6   :  { %p115_p2 = pnand %p113_p1, %p110_p0 }
   0x8   :  { %118 = shalt.err (!%p115_p2)
}
   0x9   :  { %s119_s18 = scalar_lea.vmem %s16_s10, 256  ;;  %p124_p4 = scmp.lt.s32.totalorder %s16_s10, %s16_s10 }
   0xa   :  { %p120_p3 = scmp.ne.s32.totalorder %s16_s10, %s119_s18  ;;  %p125_p5 = scmp.lt.s32.totalorder %s119_s18, %s119_s18 }
   0xc   :  { %p126_p6 = por %p125_p5, %p124_p4 }
   0xe   :  { %p127_p7 = pnand %p126_p6, %p120_p3 }
  0x10   :  { %130 = shalt.err (!%p127_p7)
}
  0x11   :  { %s182_s19 = smov 128   ;;  %s183_s20 = smov 8  }
  0x12   :  { %21 = dma.hbm_to_vmem [thread:$0]  %s237_s0, 256, %s16_s10, [#allocation3], %s182_s19, %s182_s19, %s183_s20  }
  0x13   :  { %s184_s23 = smov [#allocation5]   ;;  %s131_s27 = scalar_lea.hbm %s238_s1, 256 }
  0x14   :  { %s27_s24 = sshll.u32 %s184_s23, 4  ;;  %p132_p8 = scmp.ne.s32.totalorder %s238_s1, %s131_s27  ;;  %s28_s24 = int_to_ptr.vmem [resolvable:$true] %s27_s24 }
  0x15   :  { %p135_p9 = scmp.lt.u32.totalorder %s131_s27, %s238_s1 }
  0x17   :  { %p137_p10 = pnand %p135_p9, %p132_p8 }
  0x19   :  { %140 = shalt.err (!%p137_p10)
}
  0x1a   :  { %s141_s4 = scalar_lea.vmem %s28_s24, 256  ;;  %p146_p12 = scmp.lt.s32.totalorder %s28_s24, %s28_s24 }
  0x1b   :  { %p142_p11 = scmp.ne.s32.totalorder %s28_s24, %s141_s4  ;;  %p147_p13 = scmp.lt.s32.totalorder %s141_s4, %s141_s4 }
  0x1d   :  { %p148_p0 = por %p147_p13, %p146_p12 }
  0x1f   :  { %p149_p1 = pnand %p148_p0, %p142_p11 }
  0x21   :  { %152 = shalt.err (!%p149_p1)
}
  0x22   :  { %33 = dma.hbm_to_vmem [thread:$0]  %s238_s1, 256, %s28_s24, [#allocation6], %s182_s19, %s182_s19, %s183_s20  }
  0x23   :  { %175 = dma.done.wait [#allocation3], 256  }
  0x24   :  { %176 = vsyncadd [#allocation3], 4294967040 }
  0x25   :  { %177 = dma.done.wait [#allocation6], 256  }
  0x26   :  { %178 = vsyncadd [#allocation6], 4294967040  ;;  %v40_v0 = vld [vmem:[#allocation2] sm:$0xff]  ;;  %v41_v1 = vld [vmem:[#allocation2 + $0x8] sm:$0xff]  ;;  %s185_s1 = smov [#allocation7]  }
  0x27   :  { %v50_v2 = vand.u32 2147483647, %v40_v0  ;;  %v51_v3 = vand.u32 2147483647, %v41_v1  ;;  %v42_v14 = vld [vmem:[#allocation5] sm:$0xff]  ;;  %v43_v15 = vld [vmem:[#allocation5 + $0x8] sm:$0xff] }
  0x28   :  { %v44_v17 = vmax.f32 %v40_v0, 0.0  ;;  %v46_v18 = vmul.f32 %v42_v14, %v40_v0  ;;  %v45_v21 = vmax.f32 %v41_v1, 0.0  ;;  %v47_v22 = vmul.f32 %v43_v15, %v41_v1  ;;  %s86_s6 = sshll.u32 %s185_s1, 4  ;;  %s87_s6 = int_to_ptr.vmem [resolvable:$true] %s86_s6 }
  0x29   :  { %v52_v4 = vsub.f32 0.0, %v50_v2  ;;  %v53_v5 = vsub.f32 0.0, %v51_v3  ;;  %s153_s7 = scalar_lea.vmem %s87_s6, 128  ;;  %p158_p3 = scmp.lt.s32.totalorder %s87_s6, %s87_s6 }
  0x2a   :  { %v48_v26 = vsub.f32 %v44_v17, %v46_v18  ;;  %v49_v29 = vsub.f32 %v45_v21, %v47_v22  ;;  %p154_p2 = scmp.ne.s32.totalorder %s87_s6, %s153_s7  ;;  %p159_p4 = scmp.lt.s32.totalorder %s153_s7, %s153_s7 }
  0x2b   :  { %v54_v6 = vmul.f32 1.442695, %v52_v4  ;;  %v56_v7 = vmul.f32 1.442695, %v53_v5 }
  0x2c   :  { %p160_p5 = por %p159_p4, %p158_p3 }
  0x2d   :  { %101 = vpow2.f32 %v54_v6 }
  0x2e   :  { %103 = vpow2.f32 %v56_v7  ;;  %p161_p6 = pnand %p160_p5, %p154_p2 }
  0x37   :  { %v102_v8 = vpop.eup %101 }
  0x38   :  { %v104_v9 = vpop.eup %103  ;;  %v58_v10 = vadd.f32 1.0, %v102_v8  ;;  %v61_v12 = vmul.f32 -0.5, %v102_v8  ;;  %v64_v19 = vand.u32 2147483647, %v102_v8 }
  0x39   :  { %v67_v11 = vadd.f32 1.0, %v104_v9  ;;  %v70_v13 = vmul.f32 -0.5, %v104_v9  ;;  %v73_v23 = vand.u32 2147483647, %v104_v9 }
  0x3a   :  { %105 = vlog2.f32 %v58_v10  ;;  %v62_v16 = vadd.f32 1.0, %v61_v12  ;;  %vm65_vm0 = vcmp.lt.f32.partialorder %v64_v19, 0.0004427343 }
  0x3b   :  { %107 = vlog2.f32 %v67_v11  ;;  %v71_v20 = vadd.f32 1.0, %v70_v13  ;;  %vm74_vm1 = vcmp.lt.f32.partialorder %v73_v23, 0.0004427343 }
  0x3c   :  { %v63_v24 = vmul.f32 %v102_v8, %v62_v16 }
  0x3d   :  { %v72_v27 = vmul.f32 %v104_v9, %v71_v20 }
  0x44   :  { %v106_v25 = vpop.eup %105 }
  0x45   :  { %v108_v28 = vpop.eup %107  ;;  %v60_v30 = vmul.f32 0.6931472, %v106_v25 }
  0x46   :  { %v69_v31 = vmul.f32 0.6931472, %v108_v28 }
  0x47   :  { %v66_v32 = vsel %vm65_vm0, %v63_v24, %v60_v30 }
  0x48   :  { %v75_v33 = vsel %vm74_vm1, %v72_v27, %v69_v31  ;;  %v76_v34 = vadd.f32 %v66_v32, %v48_v26 }
  0x49   :  { %v77_v35 = vadd.f32 %v75_v33, %v49_v29 }
  0x4b   :  { %v78_v36 = vadd.f32 %v77_v35, %v76_v34 }
  0x4d   :  { %79 = vst [vmem:[#allocation7] sm:$0xff] %v78_v36 }
  0x4e   :  { %164 = shalt.err (!%p161_p6)
}
  0x4f   :  { %s165_s10 = scalar_lea.hbm %s239_s2, 128 }
  0x50   :  { %p166_p7 = scmp.ne.s32.totalorder %s239_s2, %s165_s10  ;;  %p169_p8 = scmp.lt.u32.totalorder %s165_s10, %s239_s2 }
  0x52   :  { %p171_p9 = pnand %p169_p8, %p166_p7 }
  0x54   :  { %174 = shalt.err (!%p171_p9)
}
  0x55   :  { %89 = dma.vmem_to_hbm [thread:$0]  %s87_s6, 128, %s239_s2, [#allocation4]  }
  0x56   :  { %179 = dma.done.wait [#allocation4], 128  }
  0x57   :  { %180 = vsyncadd [#allocation4], 4294967168 }
  0x58   :  { %93 = vsyncpa [#allocation3], 1 }
  0x59   :  { %94 = vsyncpa [#allocation6], 1 }
  0x5a   :  { %95 = vsyncpa [#allocation4], 1 }

</bundles_post_ra>
